<compile_context>
chip_gen: v7x
topology: tpu7x:2x2x1
jax: 0.10.0
libtpu: 0.0.40
codegen_flags: <defaults>
</compile_context>

<pallas_src>
import functools

import jax
import jax.numpy as jnp
from jax import lax
from jax.experimental import pallas as pl
from jax.experimental.pallas import tpu as pltpu

EPS = 1e-5


def _round_up(x, m):
    return (x + m - 1) // m * m


# ----------------------------------------------------------------------------------
# Fused kernel: grid = (phase, batch_tile)
#   phase 0: fc1 -> ReLU -> fc2 -> ReLU -> fc3 -> ReLU  (feature-major activations,
#            batch on lanes), h3 -> VMEM scratch, masked BN statistics accumulation.
#   phase 1: BN (global stats) -> fc4 -> sigmoid, lane-dense output store.
# ----------------------------------------------------------------------------------
def _fused_kernel(x_ref, w1_ref, b1_ref, w2_ref, b2_ref, w3_ref, b3_ref,
                  gamma_ref, beta_ref, w4_ref, b4_ref,
                  y_ref,
                  h3_scr, sum_scr, ssq_scr,
                  *, inv_n, valid_in_last, tile_b, needs_mask):
    phase = pl.program_id(0)
    i = pl.program_id(1)
    last = pl.num_programs(1) - 1

    # ------------------------------ phase 0 ---------------------------------------
    @pl.when(phase == 0)
    def _phase0():
        @pl.when(i == 0)
        def _init():
            sum_scr[...] = jnp.zeros_like(sum_scr)
            ssq_scr[...] = jnp.zeros_like(ssq_scr)

        # fc1: contract the D axis of w1 [16, D] with the batch tile x [TILE_B, D]
        # -> h [16, TILE_B]; no .T emitted at the JAX level.
        h = lax.dot_general(w1_ref[...], x_ref[...],
                            dimension_numbers=(((1,), (1,)), ((), ())),
                            preferred_element_type=jnp.float32)
        h = jnp.maximum(h + b1_ref[...], 0.0)                                  # [16, TB]
        h = jnp.maximum(jnp.dot(w2_ref[...], h,
                                preferred_element_type=jnp.float32) + b2_ref[...], 0.0)   # [8, TB]
        h = jnp.maximum(jnp.dot(w3_ref[...], h,
                                preferred_element_type=jnp.float32) + b3_ref[...], 0.0)   # [4, TB]
        h3_scr[i] = h                                   # batch-resident VMEM stash

        # Global BatchNorm statistics; padded rows masked out on the last tile only.
        if needs_mask:
            @pl.when(i == last)
            def _masked():
                col = lax.broadcasted_iota(jnp.int32, (4, tile_b), 1)
                hm = jnp.where(col < valid_in_last, h, 0.0)
                sum_scr[...] += jnp.sum(hm, axis=1, keepdims=True)             # [4, 1]
                ssq_scr[...] += jnp.sum(hm * hm, axis=1, keepdims=True)        # [4, 1]

            @pl.when(i != last)
            def _unmasked():
                sum_scr[...] += jnp.sum(h, axis=1, keepdims=True)
                ssq_scr[...] += jnp.sum(h * h, axis=1, keepdims=True)
        else:
            sum_scr[...] += jnp.sum(h, axis=1, keepdims=True)
            ssq_scr[...] += jnp.sum(h * h, axis=1, keepdims=True)

    # ------------------------------ phase 1 ---------------------------------------
    @pl.when(phase == 1)
    def _phase1():
        mean = sum_scr[...] * inv_n                                            # [4, 1]
        var = jnp.maximum(ssq_scr[...] * inv_n - mean * mean, 0.0)             # biased
        scale = gamma_ref[...] * lax.rsqrt(var + EPS)                          # [4, 1]
        shift = beta_ref[...] - mean * scale                                   # [4, 1]

        h = h3_scr[i] * scale + shift                                          # [4, TB]
        y = jnp.dot(w4_ref[...], h,
                    preferred_element_type=jnp.float32) + b4_ref[...]          # [1, TB]
        y_ref[...] = 1.0 / (1.0 + jnp.exp(-y))


# ----------------------------------------------------------------------------------
# Wrapper
# ----------------------------------------------------------------------------------
def basic_model_forward(x, params, *, tile_b=8192):
    (w1, b1, w2, b2, w3, b3, gamma, beta, w4, b4) = params
    x = x.astype(jnp.float32)
    B, D = x.shape

    d_pad = _round_up(D, 8)                                            # sublane multiple
    tile_b = max(128, _round_up(min(tile_b, _round_up(B, 128)), 128))  # lane multiple
    b_pad = _round_up(B, tile_b)
    num_tiles = b_pad // tile_b

    if d_pad != D:                                 # keep fc1 on clean tiles
        x = jnp.pad(x, ((0, 0), (0, d_pad - D)))
        w1 = jnp.pad(w1, ((0, 0), (0, d_pad - D)))
    if b_pad != B:                                 # whole number of batch tiles
        x = jnp.pad(x, ((0, b_pad - B), (0, 0)))

    # Kernel-side parameter layouts (no transposes inside the kernel).
    w1f = w1.astype(jnp.float32)                   # [16, d_pad]
    w2f = w2.astype(jnp.float32)                   # [8, 16]
    w3f = w3.astype(jnp.float32)                   # [4, 8]
    b1c = b1.reshape(-1, 1).astype(jnp.float32)    # [16, 1]
    b2c = b2.reshape(-1, 1).astype(jnp.float32)    # [8, 1]
    b3c = b3.reshape(-1, 1).astype(jnp.float32)    # [4, 1]
    gamma_c = gamma.reshape(-1, 1).astype(jnp.float32)   # [4, 1]
    beta_c = beta.reshape(-1, 1).astype(jnp.float32)     # [4, 1]
    w4_r = w4.reshape(1, -1).astype(jnp.float32)         # [1, 4]
    b4_r = b4.reshape(1, 1).astype(jnp.float32)          # [1, 1]

    const = lambda p, i: (0, 0)
    last_tile = num_tiles - 1

    # VMEM budget: double-buffered x (lane-padded to 128), double-buffered y
    # (sublane-padded to 8), batch-resident h3 scratch, plus headroom.
    vmem_need = (2 * tile_b * 128 * 4
                 + 2 * 8 * tile_b * 4
                 + 8 * b_pad * 4
                 + (4 << 20))
    vmem_limit = int(min(max(vmem_need, 32 << 20), 48 << 20))   # 48 MiB cap for v7x

    y_row = pl.pallas_call(
        functools.partial(
            _fused_kernel,
            inv_n=1.0 / B,
            valid_in_last=B - (b_pad - tile_b),
            tile_b=tile_b,
            needs_mask=(b_pad != B)),
        grid=(2, num_tiles),
        in_specs=[
            # x: batch tile during phase 0; pinned to the last-fetched block during
            # phase 1 so no redundant x HBM reads are issued there.
            pl.BlockSpec((tile_b, d_pad),
                         lambda p, i: ((1 - p) * i + p * last_tile, 0)),
            pl.BlockSpec((16, d_pad), const),      # w1 (VMEM-resident across grid)
            pl.BlockSpec((16, 1), const),          # b1
            pl.BlockSpec((8, 16), const),          # w2
            pl.BlockSpec((8, 1), const),           # b2
            pl.BlockSpec((4, 8), const),           # w3
            pl.BlockSpec((4, 1), const),           # b3
            pl.BlockSpec((4, 1), const),           # gamma
            pl.BlockSpec((4, 1), const),           # beta
            pl.BlockSpec((1, 4), const),           # w4
            pl.BlockSpec((1, 1), const),           # b4
        ],
        # y only written in phase 1; during phase 0 its block index stays at 0 so the
        # never-written buffer is not flushed before phase 1 fully overwrites it.
        out_specs=pl.BlockSpec((1, tile_b), lambda p, i: (0, p * i)),
        out_shape=jax.ShapeDtypeStruct((1, b_pad), jnp.float32),
        scratch_shapes=[
            pltpu.VMEM((num_tiles, 4, tile_b), jnp.float32),  # batch-resident h3
            pltpu.VMEM((4, 1), jnp.float32),                  # BN sum
            pltpu.VMEM((4, 1), jnp.float32),                  # BN sum of squares
        ],
        compiler_params=pltpu.CompilerParams(
            dimension_semantics=("arbitrary", "arbitrary"),
            vmem_limit_bytes=vmem_limit),
    )(x, w1f, b1c, w2f, b2c, w3f, b3c, gamma_c, beta_c, w4_r, b4_r)

    # TODO(synk): this [B, 1] relayout is an extra XLA copy (and [B, 1] lane-pads in
    # HBM); consumers that can take a flat vector should use y_row[0, :B] directly.
    return y_row[0, :B].reshape(B, 1)


# ----------------------------------------------------------------------------------
# PyTorch-style init and a pure-JAX reference
# ----------------------------------------------------------------------------------
def init_params(key, input_dim):
    def linear(key, out_f, in_f):
        kw, kb = jax.random.split(key)
        bound = 1.0 / jnp.sqrt(jnp.float32(in_f))
        w = jax.random.uniform(kw, (out_f, in_f), jnp.float32, -bound, bound)
        b = jax.random.uniform(kb, (out_f,), jnp.float32, -bound, bound)
        return w, b

    k1, k2, k3, k4 = jax.random.split(key, 4)
    w1, b1 = linear(k1, 16, input_dim)
    w2, b2 = linear(k2, 8, 16)
    w3, b3 = linear(k3, 4, 8)
    w4, b4 = linear(k4, 1, 4)
    gamma = jnp.ones((4,), jnp.float32)    # BatchNorm1d.weight default
    beta = jnp.zeros((4,), jnp.float32)    # BatchNorm1d.bias default
    return (w1, b1, w2, b2, w3, b3, gamma, beta, w4, b4)


def reference_forward(x, params):
    (w1, b1, w2, b2, w3, b3, gamma, beta, w4, b4) = params
    with jax.default_matmul_precision("highest"):
        h = jnp.maximum(x @ w1.T + b1, 0.0)
        h = jnp.maximum(h @ w2.T + b2, 0.0)
        h = jnp.maximum(h @ w3.T + b3, 0.0)
        mean = jnp.mean(h, axis=0, keepdims=True)
        var = jnp.mean((h - mean) ** 2, axis=0, keepdims=True)
        h = (h - mean) / jnp.sqrt(var + EPS) * gamma + beta
        return 1.0 / (1.0 + jnp.exp(-(h @ w4.T + b4)))


if __name__ == "__main__":
    INPUT_DIM = 32
    key = jax.random.PRNGKey(0)
    kx, kp = jax.random.split(key)
    params = init_params(kp, INPUT_DIM)

    # Check 1: multi-tile path (2 batch tiles -> cross-tile BN reduction, fused phases).
    B1 = 512
    x1 = jax.random.normal(kx, (B1, INPUT_DIM), jnp.float32)
    out1 = jax.block_until_ready(basic_model_forward(x1, params, tile_b=256))
    ref1 = reference_forward(x1, params)
    assert out1.shape == (B1, 1)
    assert jnp.allclose(out1, ref1, atol=5e-3, rtol=5e-3), \
        f"max abs err {float(jnp.max(jnp.abs(out1 - ref1)))}"

    # Check 2: padded path (batch not a multiple of the tile -> masked BN stats).
    B2 = 200
    x2 = jax.random.normal(jax.random.fold_in(kx, 1), (B2, INPUT_DIM), jnp.float32)
    out2 = jax.block_until_ready(basic_model_forward(x2, params))  # default tile_b
    ref2 = reference_forward(x2, params)
    assert out2.shape == (B2, 1)
    assert jnp.allclose(out2, ref2, atol=5e-3, rtol=5e-3), \
        f"max abs err {float(jnp.max(jnp.abs(out2 - ref2)))}"

    print("KERNEL_OK")
</pallas_src>

<mosaic_0001>
module attributes {stable_mosaic.version = 11 : i64} {
  func.func @_fused_kernel(%arg0: i32, %arg1: i32, %arg2: memref<256x32xf32, #tpu.memory_space<vmem>>, %arg3: memref<16x32xf32, #tpu.memory_space<vmem>>, %arg4: memref<16x1xf32, #tpu.memory_space<vmem>>, %arg5: memref<8x16xf32, #tpu.memory_space<vmem>>, %arg6: memref<8x1xf32, #tpu.memory_space<vmem>>, %arg7: memref<4x8xf32, #tpu.memory_space<vmem>>, %arg8: memref<4x1xf32, #tpu.memory_space<vmem>>, %arg9: memref<4x1xf32, #tpu.memory_space<vmem>>, %arg10: memref<4x1xf32, #tpu.memory_space<vmem>>, %arg11: memref<1x4xf32, #tpu.memory_space<vmem>>, %arg12: memref<1x1xf32, #tpu.memory_space<vmem>>, %arg13: memref<1x256xf32, #tpu.memory_space<vmem>>, %arg14: memref<2x4x256xf32, #tpu.memory_space<vmem>>, %arg15: memref<4x1xf32, #tpu.memory_space<vmem>>, %arg16: memref<4x1xf32, #tpu.memory_space<vmem>>) attributes {dimension_semantics = [#tpu.dimension_semantics<arbitrary>, #tpu.dimension_semantics<arbitrary>], iteration_bounds = array<i64: 2, 2>, scalar_prefetch = 0 : i64, scratch_operands = 3 : i64, tpu.core_type = #tpu.core_type<tc>, window_params = [{transform_indices = @transform_0, window_bounds = array<i64: 256, 32>}, {pipeline_mode = #tpu.pipeline_mode<synchronous>, transform_indices = @transform_1, window_bounds = array<i64: 16, 32>}, {pipeline_mode = #tpu.pipeline_mode<synchronous>, transform_indices = @transform_2, window_bounds = array<i64: 16, 1>}, {pipeline_mode = #tpu.pipeline_mode<synchronous>, transform_indices = @transform_3, window_bounds = array<i64: 8, 16>}, {pipeline_mode = #tpu.pipeline_mode<synchronous>, transform_indices = @transform_4, window_bounds = array<i64: 8, 1>}, {pipeline_mode = #tpu.pipeline_mode<synchronous>, transform_indices = @transform_5, window_bounds = array<i64: 4, 8>}, {pipeline_mode = #tpu.pipeline_mode<synchronous>, transform_indices = @transform_6, window_bounds = array<i64: 4, 1>}, {pipeline_mode = #tpu.pipeline_mode<synchronous>, transform_indices = @transform_7, window_bounds = array<i64: 4, 1>}, {pipeline_mode = #tpu.pipeline_mode<synchronous>, transform_indices = @transform_8, window_bounds = array<i64: 4, 1>}, {pipeline_mode = #tpu.pipeline_mode<synchronous>, transform_indices = @transform_9, window_bounds = array<i64: 1, 4>}, {pipeline_mode = #tpu.pipeline_mode<synchronous>, transform_indices = @transform_10, window_bounds = array<i64: 1, 1>}, {transform_indices = @transform_11, window_bounds = array<i64: 1, 256>}]} {
    %c0_i32 = arith.constant 0 : i32
    %0 = arith.cmpi eq, %arg0, %c0_i32 : i32
    %1 = arith.extui %0 : i1 to i32
    %c0_i32_0 = arith.constant 0 : i32
    %2 = arith.cmpi ne, %1, %c0_i32_0 : i32
    scf.if %2 {
      %c0_i32_2 = arith.constant 0 : i32
      %6 = arith.cmpi eq, %arg1, %c0_i32_2 : i32
      %7 = arith.extui %6 : i1 to i32
      %c0_i32_3 = arith.constant 0 : i32
      %8 = arith.cmpi ne, %7, %c0_i32_3 : i32
      scf.if %8 {
        %cst_34 = arith.constant 0.000000e+00 : f32
        %46 = vector.broadcast %cst_34 : f32 to vector<4x1xf32>
        %c0_35 = arith.constant 0 : index
        %c0_36 = arith.constant 0 : index
        %47 = vector.load %arg15[%c0_35, %c0_36] : memref<4x1xf32, #tpu.memory_space<vmem>>, vector<4x1xf32>
        tpu.vector_store %arg15[%c0_35, %c0_36], %46 {strides = array<i32>} : memref<4x1xf32, #tpu.memory_space<vmem>>, vector<4x1xf32>,
        %cst_37 = arith.constant 0.000000e+00 : f32
        %48 = vector.broadcast %cst_37 : f32 to vector<4x1xf32>
        %c0_38 = arith.constant 0 : index
        %c0_39 = arith.constant 0 : index
        %49 = vector.load %arg16[%c0_38, %c0_39] : memref<4x1xf32, #tpu.memory_space<vmem>>, vector<4x1xf32>
        tpu.vector_store %arg16[%c0_38, %c0_39], %48 {strides = array<i32>} : memref<4x1xf32, #tpu.memory_space<vmem>>, vector<4x1xf32>,
      } else {
      }
      %c0 = arith.constant 0 : index
      %c0_4 = arith.constant 0 : index
      %9 = vector.load %arg3[%c0, %c0_4] : memref<16x32xf32, #tpu.memory_space<vmem>>, vector<16x32xf32>
      %c0_5 = arith.constant 0 : index
      %c0_6 = arith.constant 0 : index
      %10 = vector.load %arg2[%c0_5, %c0_6] : memref<256x32xf32, #tpu.memory_space<vmem>>, vector<256x32xf32>
      %cst = arith.constant dense<0.000000e+00> : vector<16x256xf32>
      %11 = tpu.matmul %9, %10, %cst {dimension_numbers = #tpu.dot_dimension_numbers<[1], [1], [0], [0], [0, 0, 1, 0], [], []>} : vector<16x32xf32>, vector<256x32xf32>, vector<16x256xf32> -> vector<16x256xf32>
      %c0_7 = arith.constant 0 : index
      %c0_8 = arith.constant 0 : index
      %12 = vector.load %arg4[%c0_7, %c0_8] : memref<16x1xf32, #tpu.memory_space<vmem>>, vector<16x1xf32>
      %13 = vector.broadcast %12 : vector<16x1xf32> to vector<16x256xf32>
      %14 = arith.addf %11, %13 : vector<16x256xf32>
      %cst_9 = arith.constant 0.000000e+00 : f32
      %15 = vector.broadcast %cst_9 : f32 to vector<16x256xf32>
      %16 = arith.maximumf %14, %15 : vector<16x256xf32>
      %c0_10 = arith.constant 0 : index
      %c0_11 = arith.constant 0 : index
      %17 = vector.load %arg5[%c0_10, %c0_11] : memref<8x16xf32, #tpu.memory_space<vmem>>, vector<8x16xf32>
      %cst_12 = arith.constant dense<0.000000e+00> : vector<8x256xf32>
      %18 = tpu.matmul %17, %16, %cst_12 {dimension_numbers = #tpu.dot_dimension_numbers<[1], [0], [0], [1], [0, 0, 1, 1], [], []>} : vector<8x16xf32>, vector<16x256xf32>, vector<8x256xf32> -> vector<8x256xf32>
      %c0_13 = arith.constant 0 : index
      %c0_14 = arith.constant 0 : index
      %19 = vector.load %arg6[%c0_13, %c0_14] : memref<8x1xf32, #tpu.memory_space<vmem>>, vector<8x1xf32>
      %20 = vector.broadcast %19 : vector<8x1xf32> to vector<8x256xf32>
      %21 = arith.addf %18, %20 : vector<8x256xf32>
      %cst_15 = arith.constant 0.000000e+00 : f32
      %22 = vector.broadcast %cst_15 : f32 to vector<8x256xf32>
      %23 = arith.maximumf %21, %22 : vector<8x256xf32>
      %c0_16 = arith.constant 0 : index
      %c0_17 = arith.constant 0 : index
      %24 = vector.load %arg7[%c0_16, %c0_17] : memref<4x8xf32, #tpu.memory_space<vmem>>, vector<4x8xf32>
      %cst_18 = arith.constant dense<0.000000e+00> : vector<4x256xf32>
      %25 = tpu.matmul %24, %23, %cst_18 {dimension_numbers = #tpu.dot_dimension_numbers<[1], [0], [0], [1], [0, 0, 1, 1], [], []>} : vector<4x8xf32>, vector<8x256xf32>, vector<4x256xf32> -> vector<4x256xf32>
      %c0_19 = arith.constant 0 : index
      %c0_20 = arith.constant 0 : index
      %26 = vector.load %arg8[%c0_19, %c0_20] : memref<4x1xf32, #tpu.memory_space<vmem>>, vector<4x1xf32>
      %27 = vector.broadcast %26 : vector<4x1xf32> to vector<4x256xf32>
      %28 = arith.addf %25, %27 : vector<4x256xf32>
      %cst_21 = arith.constant 0.000000e+00 : f32
      %29 = vector.broadcast %cst_21 : f32 to vector<4x256xf32>
      %30 = arith.maximumf %28, %29 : vector<4x256xf32>
      %31 = arith.index_cast %arg1 : i32 to index
      %c0_22 = arith.constant 0 : index
      %c0_23 = arith.constant 0 : index
      %32 = vector.load %arg14[%31, %c0_22, %c0_23] : memref<2x4x256xf32, #tpu.memory_space<vmem>>, vector<1x4x256xf32>
      %33 = vector.shape_cast %32 : vector<1x4x256xf32> to vector<4x256xf32>
      %34 = vector.shape_cast %30 : vector<4x256xf32> to vector<1x4x256xf32>
      tpu.vector_store %arg14[%31, %c0_22, %c0_23], %34 {strides = array<i32>} : memref<2x4x256xf32, #tpu.memory_space<vmem>>, vector<1x4x256xf32>,
      %c0_24 = arith.constant 0 : index
      %c0_25 = arith.constant 0 : index
      %35 = vector.load %arg15[%c0_24, %c0_25] : memref<4x1xf32, #tpu.memory_space<vmem>>, vector<4x1xf32>
      %cst_26 = arith.constant dense<0.000000e+00> : vector<4xf32>
      %36 = vector.multi_reduction <add>, %30, %cst_26 [1] : vector<4x256xf32> to vector<4xf32>
      %37 = vector.shape_cast %36 : vector<4xf32> to vector<4x1xf32>
      %38 = arith.addf %35, %37 : vector<4x1xf32>
      %c0_27 = arith.constant 0 : index
      %c0_28 = arith.constant 0 : index
      %39 = vector.load %arg15[%c0_27, %c0_28] : memref<4x1xf32, #tpu.memory_space<vmem>>, vector<4x1xf32>
      tpu.vector_store %arg15[%c0_27, %c0_28], %38 {strides = array<i32>} : memref<4x1xf32, #tpu.memory_space<vmem>>, vector<4x1xf32>,
      %c0_29 = arith.constant 0 : index
      %c0_30 = arith.constant 0 : index
      %40 = vector.load %arg16[%c0_29, %c0_30] : memref<4x1xf32, #tpu.memory_space<vmem>>, vector<4x1xf32>
      %41 = arith.mulf %30, %30 : vector<4x256xf32>
      %cst_31 = arith.constant dense<0.000000e+00> : vector<4xf32>
      %42 = vector.multi_reduction <add>, %41, %cst_31 [1] : vector<4x256xf32> to vector<4xf32>
      %43 = vector.shape_cast %42 : vector<4xf32> to vector<4x1xf32>
      %44 = arith.addf %40, %43 : vector<4x1xf32>
      %c0_32 = arith.constant 0 : index
      %c0_33 = arith.constant 0 : index
      %45 = vector.load %arg16[%c0_32, %c0_33] : memref<4x1xf32, #tpu.memory_space<vmem>>, vector<4x1xf32>
      tpu.vector_store %arg16[%c0_32, %c0_33], %44 {strides = array<i32>} : memref<4x1xf32, #tpu.memory_space<vmem>>, vector<4x1xf32>,
    } else {
    }
    %c1_i32 = arith.constant 1 : i32
    %3 = arith.cmpi eq, %arg0, %c1_i32 : i32
    %4 = arith.extui %3 : i1 to i32
    %c0_i32_1 = arith.constant 0 : i32
    %5 = arith.cmpi ne, %4, %c0_i32_1 : i32
    scf.if %5 {
      %c0 = arith.constant 0 : index
      %c0_2 = arith.constant 0 : index
      %6 = vector.load %arg15[%c0, %c0_2] : memref<4x1xf32, #tpu.memory_space<vmem>>, vector<4x1xf32>
      %cst = arith.constant 0.001953125 : f32
      %7 = vector.broadcast %cst : f32 to vector<4x1xf32>
      %8 = arith.mulf %6, %7 : vector<4x1xf32>
      %c0_3 = arith.constant 0 : index
      %c0_4 = arith.constant 0 : index
      %9 = vector.load %arg16[%c0_3, %c0_4] : memref<4x1xf32, #tpu.memory_space<vmem>>, vector<4x1xf32>
      %cst_5 = arith.constant 0.001953125 : f32
      %10 = vector.broadcast %cst_5 : f32 to vector<4x1xf32>
      %11 = arith.mulf %9, %10 : vector<4x1xf32>
      %12 = arith.mulf %8, %8 : vector<4x1xf32>
      %13 = arith.subf %11, %12 : vector<4x1xf32>
      %cst_6 = arith.constant 0.000000e+00 : f32
      %14 = vector.broadcast %cst_6 : f32 to vector<4x1xf32>
      %15 = arith.maximumf %13, %14 : vector<4x1xf32>
      %c0_7 = arith.constant 0 : index
      %c0_8 = arith.constant 0 : index
      %16 = vector.load %arg9[%c0_7, %c0_8] : memref<4x1xf32, #tpu.memory_space<vmem>>, vector<4x1xf32>
      %cst_9 = arith.constant 9.99999974E-6 : f32
      %17 = vector.broadcast %cst_9 : f32 to vector<4x1xf32>
      %18 = arith.addf %15, %17 : vector<4x1xf32>
      %19 = math.rsqrt %18 : vector<4x1xf32>
      %20 = arith.mulf %16, %19 : vector<4x1xf32>
      %c0_10 = arith.constant 0 : index
      %c0_11 = arith.constant 0 : index
      %21 = vector.load %arg10[%c0_10, %c0_11] : memref<4x1xf32, #tpu.memory_space<vmem>>, vector<4x1xf32>
      %22 = arith.mulf %8, %20 : vector<4x1xf32>
      %23 = arith.subf %21, %22 : vector<4x1xf32>
      %24 = arith.index_cast %arg1 : i32 to index
      %c0_12 = arith.constant 0 : index
      %c0_13 = arith.constant 0 : index
      %25 = vector.load %arg14[%24, %c0_12, %c0_13] : memref<2x4x256xf32, #tpu.memory_space<vmem>>, vector<1x4x256xf32>
      %26 = vector.shape_cast %25 : vector<1x4x256xf32> to vector<4x256xf32>
      %27 = vector.broadcast %20 : vector<4x1xf32> to vector<4x256xf32>
      %28 = arith.mulf %26, %27 : vector<4x256xf32>
      %29 = vector.broadcast %23 : vector<4x1xf32> to vector<4x256xf32>
      %30 = arith.addf %28, %29 : vector<4x256xf32>
      %c0_14 = arith.constant 0 : index
      %c0_15 = arith.constant 0 : index
      %31 = vector.load %arg11[%c0_14, %c0_15] : memref<1x4xf32, #tpu.memory_space<vmem>>, vector<1x4xf32>
      %cst_16 = arith.constant dense<0.000000e+00> : vector<1x256xf32>
      %32 = tpu.matmul %31, %30, %cst_16 {dimension_numbers = #tpu.dot_dimension_numbers<[1], [0], [0], [1], [0, 0, 1, 1], [], []>} : vector<1x4xf32>, vector<4x256xf32>, vector<1x256xf32> -> vector<1x256xf32>
      %c0_17 = arith.constant 0 : index
      %c0_18 = arith.constant 0 : index
      %33 = vector.load %arg12[%c0_17, %c0_18] : memref<1x1xf32, #tpu.memory_space<vmem>>, vector<1x1xf32>
      %34 = vector.broadcast %33 : vector<1x1xf32> to vector<1x256xf32>
      %35 = arith.addf %32, %34 : vector<1x256xf32>
      %cst_19 = arith.constant 0.000000e+00 : f32
      %36 = vector.broadcast %cst_19 : f32 to vector<1x256xf32>
      %37 = arith.subf %36, %35 : vector<1x256xf32>
      %38 = math.exp %37 : vector<1x256xf32>
      %cst_20 = arith.constant 1.000000e+00 : f32
      %39 = vector.broadcast %cst_20 : f32 to vector<1x256xf32>
      %40 = arith.addf %39, %38 : vector<1x256xf32>
      %cst_21 = arith.constant 1.000000e+00 : f32
      %41 = vector.broadcast %cst_21 : f32 to vector<1x256xf32>
      %42 = arith.divf %41, %40 : vector<1x256xf32>
      %c0_22 = arith.constant 0 : index
      %c0_23 = arith.constant 0 : index
      %43 = vector.load %arg13[%c0_22, %c0_23] : memref<1x256xf32, #tpu.memory_space<vmem>>, vector<1x256xf32>
      tpu.vector_store %arg13[%c0_22, %c0_23], %42 {strides = array<i32>} : memref<1x256xf32, #tpu.memory_space<vmem>>, vector<1x256xf32>,
    } else {
    }
    return
  }
  func.func @transform_0(%arg0: i32, %arg1: i32) -> (i32, i32) {
    %c1_i32 = arith.constant 1 : i32
    %0 = arith.subi %c1_i32, %arg0 : i32
    %1 = arith.muli %0, %arg1 : i32
    %c1_i32_0 = arith.constant 1 : i32
    %2 = arith.muli %arg0, %c1_i32_0 : i32
    %3 = arith.addi %1, %2 : i32
    %c0_i32 = arith.constant 0 : i32
    %c0_i32_1 = arith.constant 0 : i32
    return %3, %c0_i32 : i32, i32
  }
  func.func @transform_1(%arg0: i32, %arg1: i32) -> (i32, i32) {
    %c0_i32 = arith.constant 0 : i32
    %c0_i32_0 = arith.constant 0 : i32
    %c0_i32_1 = arith.constant 0 : i32
    return %c0_i32, %c0_i32_0 : i32, i32
  }
  func.func @transform_2(%arg0: i32, %arg1: i32) -> (i32, i32) {
    %c0_i32 = arith.constant 0 : i32
    %c0_i32_0 = arith.constant 0 : i32
    %c0_i32_1 = arith.constant 0 : i32
    return %c0_i32, %c0_i32_0 : i32, i32
  }
  func.func @transform_3(%arg0: i32, %arg1: i32) -> (i32, i32) {
    %c0_i32 = arith.constant 0 : i32
    %c0_i32_0 = arith.constant 0 : i32
    %c0_i32_1 = arith.constant 0 : i32
    return %c0_i32, %c0_i32_0 : i32, i32
  }
  func.func @transform_4(%arg0: i32, %arg1: i32) -> (i32, i32) {
    %c0_i32 = arith.constant 0 : i32
    %c0_i32_0 = arith.constant 0 : i32
    %c0_i32_1 = arith.constant 0 : i32
    return %c0_i32, %c0_i32_0 : i32, i32
  }
  func.func @transform_5(%arg0: i32, %arg1: i32) -> (i32, i32) {
    %c0_i32 = arith.constant 0 : i32
    %c0_i32_0 = arith.constant 0 : i32
    %c0_i32_1 = arith.constant 0 : i32
    return %c0_i32, %c0_i32_0 : i32, i32
  }
  func.func @transform_6(%arg0: i32, %arg1: i32) -> (i32, i32) {
    %c0_i32 = arith.constant 0 : i32
    %c0_i32_0 = arith.constant 0 : i32
    %c0_i32_1 = arith.constant 0 : i32
    return %c0_i32, %c0_i32_0 : i32, i32
  }
  func.func @transform_7(%arg0: i32, %arg1: i32) -> (i32, i32) {
    %c0_i32 = arith.constant 0 : i32
    %c0_i32_0 = arith.constant 0 : i32
    %c0_i32_1 = arith.constant 0 : i32
    return %c0_i32, %c0_i32_0 : i32, i32
  }
  func.func @transform_8(%arg0: i32, %arg1: i32) -> (i32, i32) {
    %c0_i32 = arith.constant 0 : i32
    %c0_i32_0 = arith.constant 0 : i32
    %c0_i32_1 = arith.constant 0 : i32
    return %c0_i32, %c0_i32_0 : i32, i32
  }
  func.func @transform_9(%arg0: i32, %arg1: i32) -> (i32, i32) {
    %c0_i32 = arith.constant 0 : i32
    %c0_i32_0 = arith.constant 0 : i32
    %c0_i32_1 = arith.constant 0 : i32
    return %c0_i32, %c0_i32_0 : i32, i32
  }
  func.func @transform_10(%arg0: i32, %arg1: i32) -> (i32, i32) {
    %c0_i32 = arith.constant 0 : i32
    %c0_i32_0 = arith.constant 0 : i32
    %c0_i32_1 = arith.constant 0 : i32
    return %c0_i32, %c0_i32_0 : i32, i32
  }
  func.func @transform_11(%arg0: i32, %arg1: i32) -> (i32, i32) {
    %0 = arith.muli %arg0, %arg1 : i32
    %c0_i32 = arith.constant 0 : i32
    %c0_i32_0 = arith.constant 0 : i32
    return %c0_i32, %0 : i32, i32
  }
}

</mosaic_0001>

<bundles_post_ra>
// kernel: tpu_custom_call.1
= control target key start
LH: loop header
LB: loop body
LE: loop exit
PB: predicated region body
PF: predicated region fallthrough
CT: control target
= control target key end

     0   :  { %s1792_s0 = inlined_call_operand.vmem [shape: f32[512,32], index: 0, kind: input, shape index: {}]   ;;  %s1793_s1 = inlined_call_operand.vmem [shape: f32[16,32], index: 1, kind: input, shape index: {}]   ;;  %s1794_s2 = inlined_call_operand.vmem [shape: f32[16,1], index: 2, kind: input, shape index: {}]   ;;  %s1795_s3 = inlined_call_operand.vmem [shape: f32[8,16], index: 3, kind: input, shape index: {}]   ;;  %s1796_s4 = inlined_call_operand.vmem [shape: f32[8,1], index: 4, kind: input, shape index: {}]   ;;  %s1797_s5 = inlined_call_operand.vmem [shape: f32[4,8], index: 5, kind: input, shape index: {}]   ;;  %s1798_s6 = inlined_call_operand.vmem [shape: f32[4,1], index: 6, kind: input, shape index: {}]   ;;  %s1799_s7 = inlined_call_operand.vmem [shape: f32[4,1], index: 7, kind: input, shape index: {}]   ;;  %s1800_s8 = inlined_call_operand.vmem [shape: f32[4,1], index: 8, kind: input, shape index: {}]   ;;  %s1801_s9 = inlined_call_operand.vmem [shape: f32[1,4], index: 9, kind: input, shape index: {}]   ;;  %s1802_s10 = inlined_call_operand.<no memory space> [shape: f32[1,1], index: 10, kind: input, shape index: {}]   ;;  %s1803_s11 = inlined_call_operand.hbm [shape: f32[1,512], index: 11, kind: output, shape index: {}]  }
   0x1   :  { %v16_v0 = vstv %s1802_s10 }
   0x2   :  { %17 = vst [vmem:[#allocation5] sm:$0x1] %v16_v0 }
   0x3   :  { %18 = vsyncpa [#allocation7], 0 }
   0x4   :  { %20 = vsyncpa [#allocation7 + $0x1], 0  ;;  %s1538_s19 = smov 0   ;;  %s1540_s20 = smov 0  }
   0x5   :  { %s1542_s21 = smov 0   ;;  %s1544_s22 = smov 0  }
   0x6   :  { %s1546_s23 = smov 0   ;;  %s1548_s24 = smov 0  }
   0x7   :  { %s1550_s25 = smov 0   ;;  %s1552_s26 = smov 0  }
   0x8 LB: > { %1808 = sst [smem:[#allocation9_spill]] %s1457_s24  ;;  %s1129_s10 = sadd.s32 4294967295, %s1465_s26   ;;  %s1465_s26 = sphi %s1552_s26, %s26_s26   ;;  %s1461_s25 = sphi %s1550_s25, %s1819_s25   ;;  %s1457_s24 = sphi %s1548_s24, %s1818_s24   ;;  %s1453_s23 = sphi %s1546_s23, %s1817_s23   ;;  %s1449_s22 = sphi %s1544_s22, %s1816_s22   ;;  %s1445_s21 = sphi %s1542_s21, %s1822_s21   ;;  %s1441_s20 = sphi %s1540_s20, %s1821_s20   ;;  %s1437_s19 = sphi %s1538_s19, %s1820_s19  }
   0x9   : > { %1809 = sst [smem:[#allocation10_spill]] %s1461_s25  ;;  %s1130_s27 = sadd.s32 4294967294, %s1465_s26  }
   0xa   : > { %s35_s28 = sadd.s32 1, %s1457_s24  ;;  %s38_s29 = sadd.s32 1, %s1461_s25 }
   0xb   : > { %p36_p0 = scmp.ge.s32.totalorder %s35_s28, 2  ;;  %s284_s30 = smul.u32 %s1457_s24, %s1461_s25 }
   0xc   : > { %p299_p1 = scmp.ne.s32.totalorder %s1445_s21, %s1441_s20  ;;  %p300_p2 = scmp.eq.s32.totalorder %s1129_s10, 3 }
   0xd   : > { %s1824_s28 = smov (%p36_p0, %s35_s28), 0  ;;  %s1826_s29 = smov (!%p36_p0, %s38_s29), %s1461_s25 }
   0xe   : > { %1810 = sst [smem:[#allocation11_spill]] %s1824_s28  ;;  %p305_p3 = scmp.ne.s32.totalorder %s1441_s20, %s1437_s19 }
   0xf   : > { %p40_p4 = scmp.ge.s32.totalorder %s1826_s29, 2  ;;  %p306_p5 = scmp.eq.s32.totalorder %s1130_s27, 3 }
  0x10   : > { %p1591_p6 = por %p300_p2, %p299_p1  ;;  %p1133_p7 = scmp.ge.s32.totalorder %s1465_s26, 1 }
  0x11   : > { %s1828_s29 = smov (%p40_p4, %s1826_s29), 0  ;;  %p1598_p8 = por %p306_p5, %p305_p3 }
  0x12   : > { %1812 = sst [smem:[#allocation12_spill]] %s1828_s29  ;;  %p369_p9 = scmp.lt.s32.totalorder %s1465_s26, 5 }
  0x13   : > { %s285_s14 = smul.u32 %s1828_s29, %s1824_s28  ;;  %s289_s16 = sadd.s32 1, %s1445_s21 }
  0x14   : > { %p370_p10 = pnand %p1133_p7, %p369_p9 }
  0x15   : > { %s286_s15 = ssub.s32 %s284_s30, %s285_s14  ;;  %s409_s18 = sand.u32 (!%p370_p10), 1, %s1441_s20  }
  0x16   : > { %p287_p11 = scmp.eq.s32.totalorder %s286_s15, 0  ;;  %373 = sbr.rel (%p370_p10) target bundleno = 1366 (0x556), region = 64 }
  0x17   : > { %s412_s10 = ssub.s32 (!%p370_p10), 1, %s1453_s23  ;;  %s1613_s27 = sshll.u32 (!%p370_p10), %s409_s18, 1 }
  0x18   : > { %s1607_s17 = scalar_select %p287_p11, %s1445_s21, %s289_s16  }
  0x19   : > { %s413_s25 = smul.u32 (!%p370_p10), %s1449_s22, %s412_s10  ;;  %s411_s24 = scalar_lea.vmem (!%p370_p10), [#allocation6], %s1613_s27 }
  0x1a   : > { %p1137_p13 = scmp.ne.s32.totalorder (!%p370_p10), %s1453_s23, 0 }
  0x1b   : > { %s414_s29 = sadd.s32 (!%p370_p10), %s1453_s23, %s413_s25 }
  0x1c   : > { %s1135_s28 = sshll.u32 (!%p370_p10), %s414_s29, 5 }
  0x1d   : > { %p416_p12 = scmp.lt.s32.totalorder %s1135_s28, 63  ;;  %429 = sbr.rel (%p1137_p13) target bundleno = 923 (0x39b), region = 68 }
  0x1e   : > { %p1138_p0 = scmp.ne.s32.totalorder (!%p1137_p13), %s1449_s22, 0 }
  0x1f   : > { %s1830_s28 = smov (!%p416_p12, %s1135_s28), 63 }
  0x20   : > { %s1136_s30 = sshll.u32 %s1830_s28, 3 }
  0x21   : > { %s1620_s16 = scalar_lea.vmem %s1792_s0, %s1136_s30 }
  0x24   : > { %433 = sbr.rel (%p1138_p0) target bundleno = 43 (0x2b), region = 72  ;;  %vm434_vm0 = vcmask (!%p1138_p0), 3072   ;;  %v1467_v1 = vmov (!%p1138_p0), 0.0  }
  0x25   : > { %435 = vst.msk [vmem:[#allocation3] sm:$0xf] (!%p1138_p0), %vm434_vm0, %v1467_v1  ;;  %436 = vst.msk [vmem:[#allocation4] sm:$0xf] (!%p1138_p0), %vm434_vm0, %v1467_v1 }
  0x2b PF: > { %v455_v2 = vld [vmem:[%s1620_s16 + $0x80] sm:$0xff]  ;;  %v456_v3 = vld [vmem:[%s1620_s16 + $0x88] sm:$0xff]  ;;  %vm483_vm1 = vcmask 261120   ;;  %v457_v8 = vld [vmem:[%s1620_s16 + $0x90] sm:$0xff]  ;;  %v1468_v9 = vmov 0   ;;  %v1469_v56 = vmov 0.0  }
  0x2c   : > { %v439_v4 = vld [vmem:[%s1620_s16] sm:$0xff]  ;;  %v1227_v5 = vpack.c.bf16 %v456_v3, %v455_v2  ;;  %vm1630_vm2 = vmpackc.low %vm483_vm1, %vm483_vm1  ;;  %v440_v7 = vld [vmem:[%s1620_s16 + $0x8] sm:$0xff]  ;;  %1357 = vset.pattern.permute.xlu0 %v1468_v9  ;;  %1358 = vset.pattern.permute.xlu1 %v1468_v9  ;;  %vm674_vm3 = vcmask 130048   ;;  %vm758_vm4 = vcmask 64512   ;;  %s1188_s28 = sshll.u32 %s1449_s22, 3  ;;  %vm844_vm5 = vcmask 1043456  }
  0x2d   : > { %v1230_v10 = vpack.c.bf16 %v440_v7, %v439_v4  ;;  %v458_v11 = vld [vmem:[%s1620_s16 + $0x98] sm:$0xff]  ;;  %v441_v13 = vld [vmem:[%s1620_s16 + $0x10] sm:$0xff]  ;;  %v459_v15 = vld [vmem:[%s1620_s16 + $0xa0] sm:$0xff]  ;;  %742 = vmatprep.mubr.f32.mxu1 %v1469_v56  ;;  %s841_s29 = scalar_lea.vmem [#allocation2], %s1188_s28  ;;  %vm851_vm6 = vcmask 3072  }
  0x2e   : > { %1229 = vmatprep.subr.msk.bf16.mxu0 %vm1630_vm2, %v1227_v5  ;;  %v1233_v12 = vpack.c.bf16 %v458_v11, %v457_v8  ;;  %v442_v14 = vld [vmem:[%s1620_s16 + $0x18] sm:$0xff]  ;;  %v460_v16 = vld [vmem:[%s1620_s16 + $0xa8] sm:$0xff]  ;;  %v437_v19 = vld [vmem:[%s1793_s1] sm:$0xff] }
  0x2f   : > { %1232 = vmatpush3.bf16.xpose.msk.msra.mxu0 %vm1630_vm2, %v1230_v10  ;;  %v1236_v17 = vpack.c.bf16 %v442_v14, %v441_v13  ;;  %v1239_v18 = vpack.c.bf16 %v460_v16, %v459_v15  ;;  %v471_v20 = vld [vmem:[%s1794_s2] sm:$0xff]  ;;  %1223 = vmatprep.mubr.msk.f32.mxu0 %vm483_vm1, %v437_v19  ;;  %v444_v22 = vld [vmem:[%s1620_s16 + $0x28] sm:$0xff]  ;;  %v461_v23 = vld [vmem:[%s1620_s16 + $0xb0] sm:$0xff] }
  0x30   : > { %1235 = vmatprep.subr.msk.bf16.mxu0 %vm1630_vm2, %v1233_v12  ;;  %v443_v21 = vld [vmem:[%s1620_s16 + $0x20] sm:$0xff]  ;;  %475 = vperm.xlu0 %1357, %v471_v20   ;;  %v462_v24 = vld [vmem:[%s1620_s16 + $0xb8] sm:$0xff]  ;;  %v472_v25 = vld [vmem:[%s1794_s2 + $0x8] sm:$0xff] }
  0x31   : > { %v1242_v26 = vpack.c.bf16 %v444_v22, %v443_v21  ;;  %v1245_v27 = vpack.c.bf16 %v462_v24, %v461_v23  ;;  %v445_v28 = vld [vmem:[%s1620_s16 + $0x30] sm:$0xff]  ;;  %v446_v29 = vld [vmem:[%s1620_s16 + $0x38] sm:$0xff]  ;;  %v463_v30 = vld [vmem:[%s1620_s16 + $0xc0] sm:$0xff] }
  0x32   : > { %v464_v31 = vld [vmem:[%s1620_s16 + $0xc8] sm:$0xff]  ;;  %v1248_v32 = vpack.c.bf16 %v446_v29, %v445_v28  ;;  %v447_v34 = vld [vmem:[%s1620_s16 + $0x40] sm:$0xff]  ;;  %v465_v36 = vld [vmem:[%s1620_s16 + $0xd0] sm:$0xff] }
  0x33   : > { %v1251_v33 = vpack.c.bf16 %v464_v31, %v463_v30  ;;  %v448_v35 = vld [vmem:[%s1620_s16 + $0x48] sm:$0xff]  ;;  %v466_v37 = vld [vmem:[%s1620_s16 + $0xd8] sm:$0xff]  ;;  %v449_v40 = vld [vmem:[%s1620_s16 + $0x50] sm:$0xff] }
  0x34   : > { %480 = vperm.xlu0 %1357, %v472_v25   ;;  %v1254_v38 = vpack.c.bf16 %v448_v35, %v447_v34  ;;  %v1257_v39 = vpack.c.bf16 %v466_v37, %v465_v36  ;;  %v450_v41 = vld [vmem:[%s1620_s16 + $0x58] sm:$0xff]  ;;  %v467_v42 = vld [vmem:[%s1620_s16 + $0xe0] sm:$0xff]  ;;  %v468_v43 = vld [vmem:[%s1620_s16 + $0xe8] sm:$0xff] }
  0x35   : > { %v1260_v44 = vpack.c.bf16 %v450_v41, %v449_v40  ;;  %v1263_v45 = vpack.c.bf16 %v468_v43, %v467_v42  ;;  %v451_v46 = vld [vmem:[%s1620_s16 + $0x60] sm:$0xff]  ;;  %v452_v47 = vld [vmem:[%s1620_s16 + $0x68] sm:$0xff]  ;;  %v469_v48 = vld [vmem:[%s1620_s16 + $0xf0] sm:$0xff] }
  0x36   : > { %v470_v49 = vld [vmem:[%s1620_s16 + $0xf8] sm:$0xff]  ;;  %v1266_v50 = vpack.c.bf16 %v452_v47, %v451_v46  ;;  %v453_v52 = vld [vmem:[%s1620_s16 + $0x70] sm:$0xff]  ;;  %v438_v55 = vld [vmem:[%s1793_s1 + $0x8] sm:$0xff] }
  0x37   : > { %1238 = vmatpush3.bf16.xpose.msk.msra.mxu0 %vm1630_vm2, %v1236_v17  ;;  %v1269_v51 = vpack.c.bf16 %v470_v49, %v469_v48  ;;  %v454_v53 = vld [vmem:[%s1620_s16 + $0x78] sm:$0xff]  ;;  %v668_v57 = vld [vmem:[%s1796_s4] sm:$0xff]  ;;  %v843_v36 = vld [vmem:[#allocation3] sm:$0xf] }
  0x38   : > { %1241 = vmatprep.subr.msk.bf16.mxu0 %vm1630_vm2, %v1239_v18  ;;  %v1272_v54 = vpack.c.bf16 %v454_v53, %v453_v52  ;;  %671 = vperm.xlu1 %1358, %v668_v57   ;;  %v752_v58 = vld [vmem:[%s1798_s6] sm:$0xf] }
  0x39   : > { %v667_v11 = vld [vmem:[%s1795_s3] sm:$0xff] }
  0x3c   : > { %755 = vperm.xlu1 %1358, %v752_v58  }
  0x3f   : > { %1244 = vmatpush3.bf16.xpose.msk.msra.mxu0 %vm1630_vm2, %v1242_v26 }
  0x40   : > { %1247 = vmatprep.subr.msk.bf16.mxu0 %vm1630_vm2, %v1245_v27 }
  0x47   : > { %1250 = vmatpush3.bf16.xpose.msk.msra.mxu0 %vm1630_vm2, %v1248_v32 }
  0x48   : > { %1253 = vmatprep.subr.msk.bf16.mxu0 %vm1630_vm2, %v1251_v33 }
  0x4f   : > { %1256 = vmatpush3.bf16.xpose.msk.msra.mxu0 %vm1630_vm2, %v1254_v38  ;;  %v853_v38 = vld [vmem:[#allocation4] sm:$0xf] }
  0x50   : > { %1259 = vmatprep.subr.msk.bf16.mxu0 %vm1630_vm2, %v1257_v39 }
  0x57   : > { %1262 = vmatpush3.bf16.xpose.msk.msra.mxu0 %vm1630_vm2, %v1260_v44 }
  0x58   : > { %1265 = vmatprep.subr.msk.bf16.mxu0 %vm1630_vm2, %v1263_v45 }
  0x5f   : > { %1268 = vmatpush3.bf16.xpose.msk.msra.mxu0 %vm1630_vm2, %v1266_v50 }
  0x60   : > { %1271 = vmatprep.subr.msk.bf16.mxu0 %vm1630_vm2, %v1269_v51 }
  0x67   : > { %1274 = vmatpush3.bf16.xpose.msk.msra.mxu0 %vm1630_vm2, %v1272_v54 }
  0x6e   : > { %1224 = vmatmul.mubr.msk.f32.vlgmr.msra.gmra.mrb[0].mxu0 %vm483_vm1, %v437_v19  ;;  %v751_v19 = vld [vmem:[%s1797_s5] sm:$0xf] }
  0x6f   : > { %1225 = vmatprep.mubr.msk.f32.mxu0 %vm483_vm1, %v438_v55 }
  0x72   : > { %1226 = vmatmul.mubr.msk.f32.gmra.mrb[2].mxu0 %vm483_vm1, %v438_v55 }
  0xaf   : > { %v476_v59 = vpop.permute.xlu0 %475 }
  0xb3   : > { %v481_v63 = vpop.permute.xlu0 %480 }
  0xb7   : > { %v672_v12 = vpop.permute.xlu1 %671 }
  0xbb   : > { %v756_v20 = vpop.permute.xlu1 %755 }
 0x141   : > { %v652_v60 = vpop.f32.mrb[0].mxu0 }
 0x142   : > { %v654_v61 = vpop.f32.mrb[1].mxu0  ;;  %v653_v62 = vadd.f32 %v652_v60, %v476_v59 }
 0x143   : > { %v655_v0 = vadd.f32 %v654_v61, %v476_v59 }
 0x144   : > { %v663_v5 = vmax.f32 %v653_v62, 0.0 }
 0x145   : > { %v658_v1 = vpop.f32.mrb[2].mxu0  ;;  %v664_v7 = vmax.f32 %v655_v0, 0.0 }
 0x146   : > { %v659_v2 = vadd.f32 %v658_v1, %v481_v63  ;;  %v660_v3 = vpop.f32.mrb[3].mxu0 }
 0x147   : > { %v661_v4 = vadd.f32 %v660_v3, %v481_v63 }
 0x148   : > { %v665_v6 = vmax.f32 %v659_v2, 0.0 }
 0x149   : > { %v666_v8 = vmax.f32 %v661_v4, 0.0 }
 0x14a   : > { %v1277_v9 = vpack.c.bf16 %v665_v6, %v663_v5 }
 0x14b   : > { %v1275_v10 = vpack.c.bf16 %v666_v8, %v664_v7 }
 0x14d   : > { %1276 = vmatprep.subr.bf16.mxu1 %v1275_v10 }
 0x14e   : > { %1278 = vmatpush1.bf16.msra.mxu1 %v1277_v9 }
 0x151   : > { %1173 = vmatmul.mubr.msk.f32.vlgmr.msra.gmra.mrb[0].mxu1 %vm674_vm3, %v667_v11 }
 0x152   : > { %826 = vmatprep.mubr.f32.mxu1 %v1469_v56 }
 0x224   : > { %v744_v13 = vpop.f32.mrb[0].mxu1 }
 0x225   : > { %v745_v14 = vadd.f32 %v744_v13, %v672_v12  ;;  %v746_v15 = vpop.f32.mrb[1].mxu1 }
 0x226   : > { %v747_v16 = vadd.f32 %v746_v15, %v672_v12 }
 0x227   : > { %v749_v18 = vmax.f32 %v745_v14, 0.0 }
 0x228   : > { %v750_v17 = vmax.f32 %v747_v16, 0.0 }
 0x22a   : > { %762 = vmatprep.subr.mxu1 %v750_v17 }
 0x22b   : > { %763 = vmatpush1.msra.mxu1 %v749_v18 }
 0x22c   : > { %1174 = vmatmul.mubr.msk.f32.vlgmr.msra.gmra.mrb[2].mxu1 %vm758_vm4, %v751_v19 }
 0x2ff   : > { %v828_v21 = vpop.f32.mrb[2].mxu1 }
 0x300   : > { %v829_v22 = vadd.f32 %v828_v21, %v756_v20  ;;  %v830_v23 = vpop.f32.mrb[3].mxu1 }
 0x301   : > { %v831_v24 = vadd.f32 %v830_v23, %v756_v20 }
 0x302   : > { %v833_v25 = vmax.f32 %v829_v22, 0.0 }
 0x303   : > { %v834_v26 = vmax.f32 %v831_v24, 0.0 }
 0x304   : > { %v845_v27 = vsel %vm844_vm5, %v833_v25, 0.0  ;;  %v854_v28 = vmul.f32 %v833_v25, %v833_v25 }
 0x305   : > { %v837_v29 = vcombine.low %v833_v25, %v834_v26  ;;  %v846_v30 = vsel %vm844_vm5, %v834_v26, 0.0  ;;  %v855_v31 = vmul.f32 %v834_v26, %v834_v26 }
 0x306   : > { %v847_v32 = vadd.f32 %v846_v30, %v845_v27  ;;  %v856_v33 = vsel %vm844_vm5, %v854_v28, 0.0 }
 0x307   : > { %842 = vst [vmem:[%s841_s29] sm:$0xff] %v837_v29  ;;  %v857_v34 = vsel %vm844_vm5, %v855_v31, 0.0 }
 0x308   : > { %848 = vadd.xlane.f32.xlu0 %v847_v32  ;;  %v858_v35 = vadd.f32 %v857_v34, %v856_v33 }
 0x30a   : > { %859 = vadd.xlane.f32.xlu1 %v858_v35 }
 0x395   : > { %v849_v37 = vpop.xlane.xlu0 %848 }
 0x396   : > { %v850_v39 = vadd.f32 %v849_v37, %v843_v36 }
 0x397   : > { %v860_v40 = vpop.xlane.xlu1 %859 }
 0x398   : > { %852 = vst.msk [vmem:[#allocation3] sm:$0xf] %vm851_vm6, %v850_v39  ;;  %v861_v41 = vadd.f32 %v860_v40, %v853_v38 }
 0x39a   : > { %862 = vst.msk [vmem:[#allocation4] sm:$0xf] %vm851_vm6, %v861_v41 }
 0x39b PF: > { %p1177_p1 = scmp.ne.s32.totalorder %s1453_s23, 1 }
 0x39c   : > { %v1470_v44 = vmov (!%p1177_p1), 0   ;;  %v874_v51 = vld [vmem:[%s1799_s7] sm:$0xf] (!%p1177_p1)  ;;  %v1471_v57 = vmov (!%p1177_p1), 0.0   ;;  %v912_v58 = vld [vmem:[#allocation5] sm:$0x1] (!%p1177_p1)  ;;  %v892_v61 = vlaneseq (!%p1177_p1) }
 0x39d   : > { %866 = sbr.rel (%p1177_p1) target bundleno = 1341 (0x53d), region = 76  ;;  %1359 = vset.pattern.permute.xlu0 (!%p1177_p1), %v1470_v44  ;;  %1360 = vset.pattern.permute.xlu1 (!%p1177_p1), %v1470_v44  ;;  %v878_v54 = vld [vmem:[%s1800_s8] sm:$0xf] (!%p1177_p1)  ;;  %v1472_v59 = vmov (!%p1177_p1), 839922192   ;;  %s1189_s15 = sshll.u32 (!%p1177_p1), %s1449_s22, 3 }
 0x39e   : > { %997 = vmatprep.mubr.f32.mxu0 (!%p1177_p1), %v1471_v57  ;;  %915 = vperm.xlu1 (!%p1177_p1), %1360, %v912_v58   ;;  %v890_v60 = vunpack.c.l.s4 (!%p1177_p1), %v1472_v59  ;;  %v893_v63 = vshrl.u32 (!%p1177_p1), %v892_v61, 7  ;;  %s883_s25 = scalar_lea.vmem (!%p1177_p1), [#allocation2], %s1189_s15  ;;  %vm928_vm7 = vcmask (!%p1177_p1), 1043456   ;;  %v911_v9 = vld [vmem:[%s1801_s9] sm:$0x1] (!%p1177_p1)  ;;  %vm924_vm8 = vcmask (!%p1177_p1), 31744  }
 0x39f   : > { %v867_v42 = vld [vmem:[#allocation3] sm:$0xf] (!%p1177_p1)  ;;  %v884_v3 = vld [vmem:[%s883_s25] sm:$0xff] (!%p1177_p1)  ;;  %v1473_v25 = vmov (!%p1177_p1), 1966171168   ;;  %vm1036_vm9 = vcmp.lt.s32.totalorder (!%p1177_p1), %v892_v61, 256 }
 0x3a0   : > { %v868_v45 = vmul.f32 (!%p1177_p1), 0.001953125, %v867_v42  ;;  %v891_v62 = vunpack.c.0.s8 (!%p1177_p1), %v890_v60  ;;  %v920_v10 = vsub.s32 (!%p1177_p1), 0, %v893_v63  ;;  %v1020_v26 = vunpack.c.l.s4 (!%p1177_p1), %v1473_v25 }
 0x3a1   : > { %v869_v43 = vld [vmem:[#allocation4] sm:$0xf] (!%p1177_p1) }
 0x3a2   : > { %v870_v46 = vmul.f32 (!%p1177_p1), 0.001953125, %v869_v43  ;;  %v871_v47 = vmul.f32 (!%p1177_p1), %v868_v45, %v868_v45  ;;  %v894_v0 = vsub.s32 (!%p1177_p1), %v891_v62, %v893_v63  ;;  %v1021_v27 = vunpack.c.0.s8 (!%p1177_p1), %v1020_v26 }
 0x3a4   : > { %v872_v48 = vsub.f32 %v870_v46, %v871_v47  ;;  %v1024_v29 = vsub.s32 %v1021_v27, %v893_v63 }
 0x3a6   : > { %v873_v49 = vmax.f32 %v872_v48, 0.0 }
 0x3a8   : > { %v875_v50 = vadd.f32 1e-05, %v873_v49 }
 0x3aa   : > { %1361 = vrsqrt.f32 %v875_v50 }
 0x3b4   : > { %v1362_v52 = vpop.eup %1361 }
 0x3b5   : > { %v877_v53 = vmul.f32 %v1362_v52, %v874_v51 }
 0x3b7   : > { %887 = vperm.xlu0 %1359, %v877_v53   ;;  %v879_v55 = vmul.f32 %v877_v53, %v868_v45 }
 0x3b9   : > { %v880_v56 = vsub.f32 %v878_v54, %v879_v55 }
 0x3bb   : > { %900 = vperm.xlu0 %1359, %v880_v56  }
 0x41d   : > { %v916_v11 = vpop.permute.xlu1 %915 }
 0x41e   : > { %v921_v12 = vrot.slane %v916_v11, %v920_v10 }
 0x436   : > { %v888_v1 = vpop.permute.xlu0 %887 }
 0x437   : > { %v895_v2 = vrot.slane %v888_v1, %v894_v0 }
 0x439   : > { %v897_v5 = vmul.f32 %v895_v2, %v884_v3 }
 0x43a   : > { %v901_v4 = vpop.permute.xlu0 %900 }
 0x43b   : > { %v908_v6 = vrot.slane %v901_v4, %v894_v0 }
 0x43d   : > { %v910_v7 = vadd.f32 %v908_v6, %v897_v5 }
 0x43f   : > { %v923_v8 = vcombine.high %v910_v7, %v910_v7 }
 0x441   : > { %1180 = vmatprep.subr.msk.mxu0 %vm928_vm7, %v923_v8 }
 0x442   : > { %1181 = vmatpush1.msk.msra.mxu0 %vm928_vm7, %v910_v7 }
 0x443   : > { %1182 = vmatmul.mubr.msk.f32.vlgmr.msra.gmra.mrb[0].mxu0 %vm924_vm8, %v911_v9 }
 0x516   : > { %v999_v13 = vpop.f32.mrb[0].mxu0 }
 0x517   : > { %v1000_v14 = vadd.f32 %v999_v13, %v921_v12  ;;  %v1001_v15 = vpop.f32.mrb[1].mxu0 }
 0x518   : > { %v1002_v16 = vadd.f32 %v1001_v15, %v921_v12 }
 0x519   : > { %v1004_v17 = vsub.f32 0.0, %v1000_v14 }
 0x51a   : > { %v1005_v18 = vsub.f32 0.0, %v1002_v16 }
 0x51b   : > { %v1006_v19 = vmul.f32 1.442695, %v1004_v17 }
 0x51c   : > { %v1008_v20 = vmul.f32 1.442695, %v1005_v18 }
 0x51d   : > { %1363 = vpow2.f32 %v1006_v19 }
 0x51e   : > { %1365 = vpow2.f32 %v1008_v20 }
 0x527   : > { %v1364_v21 = vpop.eup %1363 }
 0x528   : > { %v1366_v22 = vpop.eup %1365  ;;  %v1010_v23 = vadd.f32 1.0, %v1364_v21 }
 0x529   : > { %v1011_v24 = vadd.f32 1.0, %v1366_v22 }
 0x52a   : > { %1367 = vrcp.f32 %v1010_v23 }
 0x52b   : > { %1369 = vrcp.f32 %v1011_v24 }
 0x534   : > { %v1368_v28 = vpop.eup %1367 }
 0x535   : > { %v1370_v30 = vpop.eup %1369 }
 0x536   : > { %v1018_v31 = vcombine.low %v1368_v28, %v1370_v30 }
 0x538   : > { %v1025_v32 = vrot.slane %v1018_v31, %v1024_v29 }
 0x53a   : > { %v1032_v33 = vrot.slane %v1025_v32, %v1024_v29 }
 0x53c   : > { %1038 = vst.msk [vmem:[%s411_s24] sm:$0x3] %vm1036_vm9, %v1032_v33 }
 0x53d PF: > { %s1047_s16 = smul.u32 %s1449_s22, %s1453_s23  ;;  %s1055_s10 = sshll.u32 %s411_s24, 4  ;;  %s1741_s10 = int_to_ptr.vmem [resolvable:$true] %s1055_s10 }
 0x53e   : > { %s1040_s28 = scalar_lea.sflag [#allocation7], %s409_s18  ;;  %s1371_s29 = scalar_lea.vmem %s1741_s10, 32 }
 0x53f   : > { %s1190_s30 = sshll.u32 %s1047_s16, 5  ;;  %p1372_p2 = scmp.ne.s32.totalorder %s1741_s10, %s1371_s29 }
 0x540   : > { %s1053_s25 = scalar_lea.hbm %s1803_s11, %s1190_s30  ;;  %s1474_s22 = smov [#allocation6]  }
 0x541   : > { %p1373_p3 = pnand %p1372_p2, %p1591_p6  ;;  %s1375_s23 = sshll.u32 %s1474_s22, 4  ;;  %s1376_s23 = int_to_ptr.vmem [resolvable:$false] %s1375_s23 }
 0x542   : > { %s1377_s24 = scalar_lea.vmem %s1376_s23, 64  ;;  %p1378_p5 = scmp.lt.s32.totalorder %s1741_s10, %s1376_s23 }
 0x543   : > { %p1374_p4 = pneg %p1373_p3  ;;  %p1379_p7 = scmp.lt.s32.totalorder %s1377_s24, %s1371_s29 }
 0x545   : > { %p1380_p9 = por %p1379_p7, %p1378_p5 }
 0x547   : > { %p1381_p10 = pnand %p1380_p9, %p1374_p4 }
 0x549   : > { %1384 = shalt.err (!%p1381_p10)
}
 0x54a   : > { %s1385_s27 = scalar_lea.hbm %s1053_s25, 32  ;;  %s1389_s30 = scalar_lea.hbm %s1803_s11, 64 }
 0x54b   : > { %p1386_p11 = scmp.ne.s32.totalorder %s1053_s25, %s1385_s27  ;;  %p1390_p0 = scmp.lt.u32.totalorder %s1053_s25, %s1803_s11 }
 0x54c   : > { %p1391_p1 = scmp.lt.u32.totalorder %s1389_s30, %s1385_s27  ;;  %p1393_p3 = scmp.lt.u32.totalorder %s1385_s27, %s1053_s25 }
 0x54d   : > { %p1387_p12 = pnand %p1386_p11, %p1591_p6 }
 0x54e   : > { %p1392_p2 = por %p1391_p1, %p1390_p0 }
 0x54f   : > { %p1388_p13 = pneg %p1387_p12 }
 0x550   : > { %p1394_p5 = por %p1393_p3, %p1392_p2 }
 0x552   : > { %p1395_p4 = pnand %p1394_p5, %p1388_p13 }
 0x554   : > { %1398 = shalt.err (!%p1395_p4)
}
 0x555   : > { %1279 = dma.vmem_to_hbm [thread:$0]  (%p1591_p6), %s1741_s10, 32, %s1053_s25, %s1040_s28  }
 0x556 PF: > { %p1285_p7 = scmp.ge.s32.totalorder %s1465_s26, 2  ;;  %s1067_s29 = sand.u32 1, %s1437_s19  }
 0x557   : > { %s1068_s22 = scalar_lea.sflag [#allocation7], %s1067_s29 }
 0x558   : > { %p1282_p9 = pnand %p1285_p7, %p1598_p8 }
 0x55a   : > { %1432 = dma.done.wait (!%p1282_p9), %s1068_s22, 32  }
 0x55b   : > { %1434 = vsyncadd (!%p1282_p9), %s1068_s22, 4294967264  ;;  %s26_s26 = sadd.s32 1, %s1465_s26   ;;  %s1816_s22 = sld [smem:[#allocation9_spill]] }
 0x55c   : > { %p23_p10 = scmp.ge.s32.totalorder %s26_s26, 6   ;;  %s1817_s23 = sld [smem:[#allocation10_spill]] }
 0x55d   : > { %s1818_s24 = sld [smem:[#allocation11_spill]]  ;;  %s1819_s25 = sld [smem:[#allocation12_spill]] }
 0x55e   : > { %s1820_s19 = smov %s1441_s20  ;;  %s1821_s20 = smov %s1445_s21 }
 0x55f   : > { %s1822_s21 = smov %s1607_s17  ;;  %25 = sbr.rel (!%p23_p10) target bundleno = 8 (0x8), region = 113 }
 0x566   :  { %1073 = vsyncpa [#allocation7], 1 }
 0x567   :  { %1075 = vsyncpa [#allocation7 + $0x1], 1 }

</bundles_post_ra>
